<compile_context>
chip_gen: v7x
topology: tpu7x:2x2x1
jax: 0.10.0
libtpu: 0.0.40
codegen_flags: <defaults>
</compile_context>

<pallas_src>
import functools

import jax
import jax.numpy as jnp
from jax import lax
from jax.experimental import pallas as pl
from jax.experimental.pallas import tpu as pltpu


def _feature_corr_kernel(a_ref, b_ref, o_ref):
    # a_ref: (C_pad, TM)  lane-dense tile of A (columns = A spatial positions, w-major)
    # b_ref: (C_pad, TN)  lane-dense tile of B (columns = B spatial positions, h-major)
    # o_ref: (TM, TN)     tile of feature_mul^T = A_tile^T @ B_tile
    # Contract dim 0 of both operands directly on the MXU (no materialized lane-sparse
    # transpose of the (C_pad, TM) tile).
    o_ref[...] = lax.dot_general(
        a_ref[...],
        b_ref[...],
        dimension_numbers=(((0,), (0,)), ((), ())),
        preferred_element_type=jnp.float32,
    ).astype(o_ref.dtype)


@functools.partial(jax.jit, static_argnames=("tm_cap", "tn_cap", "out_dtype"))
def feature_correlation(featureA, featureB, *, tm_cap=512, tn_cap=2048, out_dtype=None):
    """featureA, featureB: (b, c, h, w) -> (b, h*w, h, w)."""
    assert tm_cap % 128 == 0 and tn_cap % 128 == 0
    b, c, h, w = featureA.shape
    hw = h * w
    out_dtype = featureA.dtype if out_dtype is None else out_dtype
    # TODO(synk): out_dtype=jnp.bfloat16 halves output HBM traffic (the kernel is output-write
    # bound) if the downstream consumer (ReLU / L2-norm) tolerates it; kept f32 by default.

    # A: transpose(2,3) then flatten spatial (w-major) -> (b, c, hw). Small XLA transpose.
    a_km = jnp.transpose(featureA, (0, 1, 3, 2)).reshape(b, c, hw)
    # B: flatten spatial (h-major), channels stay leading -> (b, c, hw). Free view.
    b_km = featureB.reshape(b, c, hw)

    # Zero-pad channels (contraction / sublane dim) to the f32 sublane multiple; zeros do not
    # change the contraction.
    # TODO(synk): could pass full-extent c unpadded (+ allow_input_fusion) once non-8-aligned
    # contraction blocks are verified to zero-pad correctly in Mosaic.
    c_pad = ((c + 7) // 8) * 8
    if c_pad != c:
        pad = ((0, 0), (0, c_pad - c), (0, 0))
        a_km = jnp.pad(a_km, pad)
        b_km = jnp.pad(b_km, pad)

    # Output tiling: full extent when hw fits the cap (full-extent dims are exempt from the
    # (8,128) rule), else fixed 128-aligned tiles with a cdiv grid. Ragged output tails are
    # masked/dropped by Pallas; garbage tail inputs only feed those dropped outputs.
    tm = hw if hw <= tm_cap else tm_cap
    tn = hw if hw <= tn_cap else tn_cap
    m_blocks = pl.cdiv(hw, tm)
    n_blocks = pl.cdiv(hw, tn)

    # v7x megacore: ensure the fully-parallel grid has >= 2 steps so both TensorCores get work.
    if b * m_blocks * n_blocks < 2 and hw >= 256:
        tm = 128 * max(1, (hw // 2) // 128)
        m_blocks = pl.cdiv(hw, tm)

    grid = (b, m_blocks, n_blocks)

    # Double-buffered tile footprint; raise the scoped VMEM limit so bigger output tiles
    # (longer unmasked lane-dense stores, fewer ~0.35us grid-step overheads) always fit.
    vmem_need = 2 * 4 * (tm * tn + c_pad * (tm + tn)) + (2 << 20)
    vmem_limit_bytes = int(min(max(vmem_need, 32 << 20), 100 << 20))

    cost = pl.CostEstimate(
        flops=2 * b * hw * hw * c,
        transcendentals=0,
        # Output written once; A fetched once (its block is constant along the innermost n
        # axis -- refetch-minimizing order); B re-fetched once per m block.
        bytes_accessed=4 * (b * hw * hw + b * hw * c_pad * (1 + m_blocks)),
    )

    feature_mul_t = pl.pallas_call(
        _feature_corr_kernel,
        out_shape=jax.ShapeDtypeStruct((b, hw, hw), out_dtype),
        grid_spec=pltpu.PrefetchScalarGridSpec(
            num_scalar_prefetch=0,
            grid=grid,
            in_specs=[
                # Batch dim squeezed out of the kernel refs (kernel sees 2-D tiles).
                pl.BlockSpec((None, c_pad, tm), lambda bi, mi, ni: (bi, 0, mi)),
                pl.BlockSpec((None, c_pad, tn), lambda bi, mi, ni: (bi, 0, ni)),
            ],
            out_specs=pl.BlockSpec((None, tm, tn), lambda bi, mi, ni: (bi, mi, ni)),
        ),
        compiler_params=pltpu.CompilerParams(
            dimension_semantics=("parallel", "parallel", "parallel"),
            vmem_limit_bytes=vmem_limit_bytes,
        ),
        cost_estimate=cost,
    )(a_km, b_km)

    # feature_mul^T[b, i, j] with j = h_j*w + w_j  ->  (b, hw, h, w) is a free view.
    return feature_mul_t.reshape(b, hw, h, w)


def _reference(featureA, featureB):
    # Pure-JAX reimplementation of the torch forward, for correctness check.
    b, c, h, w = featureA.shape
    a_km = jnp.transpose(featureA, (0, 1, 3, 2)).reshape(b, c, h * w)
    b_nk = jnp.transpose(featureB.reshape(b, c, h * w), (0, 2, 1))
    fm = jnp.einsum("bnc,bcm->bnm", b_nk, a_km)
    return jnp.transpose(fm.reshape(b, h, w, h * w), (0, 3, 1, 2))


if __name__ == "__main__":
    key = jax.random.PRNGKey(0)
    kA, kB = jax.random.split(key)
    b, c, h, w = 2, 4, 16, 16
    featureA = jax.random.normal(kA, (b, c, h, w), dtype=jnp.float32)
    featureB = jax.random.normal(kB, (b, c, h, w), dtype=jnp.float32)

    out = feature_correlation(featureA, featureB)
    out = jax.block_until_ready(out)

    ref = _reference(featureA, featureB)
    assert out.shape == (b, h * w, h, w)
    assert jnp.allclose(out, ref, atol=1e-5, rtol=1e-5)
    print("KERNEL_OK")
</pallas_src>

<mosaic_0001>
module attributes {stable_mosaic.version = 11 : i64} {
  func.func @_feature_corr_kernel(%arg0: i32, %arg1: i32, %arg2: i32, %arg3: memref<1x8x256xf32, #tpu.memory_space<vmem>>, %arg4: memref<1x8x256xf32, #tpu.memory_space<vmem>>, %arg5: memref<1x256x256xf32, #tpu.memory_space<vmem>>) attributes {dimension_semantics = [#tpu.dimension_semantics<parallel>, #tpu.dimension_semantics<parallel>, #tpu.dimension_semantics<parallel>], iteration_bounds = array<i64: 2, 1, 1>, scalar_prefetch = 0 : i64, scratch_operands = 0 : i64, tpu.core_type = #tpu.core_type<tc>, window_params = [{transform_indices = @transform_0, window_bounds = array<i64: 1, 8, 256>}, {transform_indices = @transform_1, window_bounds = array<i64: 1, 8, 256>}, {transform_indices = @transform_2, window_bounds = array<i64: 1, 256, 256>}]} {
    %c0 = arith.constant 0 : index
    %c0_0 = arith.constant 0 : index
    %c0_1 = arith.constant 0 : index
    %0 = vector.load %arg3[%c0, %c0_0, %c0_1] : memref<1x8x256xf32, #tpu.memory_space<vmem>>, vector<1x8x256xf32>
    %1 = vector.shape_cast %0 : vector<1x8x256xf32> to vector<8x256xf32>
    %c0_2 = arith.constant 0 : index
    %c0_3 = arith.constant 0 : index
    %c0_4 = arith.constant 0 : index
    %2 = vector.load %arg4[%c0_2, %c0_3, %c0_4] : memref<1x8x256xf32, #tpu.memory_space<vmem>>, vector<1x8x256xf32>
    %3 = vector.shape_cast %2 : vector<1x8x256xf32> to vector<8x256xf32>
    %cst = arith.constant dense<0.000000e+00> : vector<256x256xf32>
    %4 = tpu.matmul %1, %3, %cst {dimension_numbers = #tpu.dot_dimension_numbers<[0], [0], [1], [1], [0, 1, 1, 1], [], []>} : vector<8x256xf32>, vector<8x256xf32>, vector<256x256xf32> -> vector<256x256xf32>
    %c0_5 = arith.constant 0 : index
    %c0_6 = arith.constant 0 : index
    %c0_7 = arith.constant 0 : index
    %5 = vector.load %arg5[%c0_5, %c0_6, %c0_7] : memref<1x256x256xf32, #tpu.memory_space<vmem>>, vector<1x256x256xf32>
    %6 = vector.shape_cast %5 : vector<1x256x256xf32> to vector<256x256xf32>
    %7 = vector.shape_cast %4 : vector<256x256xf32> to vector<1x256x256xf32>
    tpu.vector_store %arg5[%c0_5, %c0_6, %c0_7], %7 {strides = array<i32>} : memref<1x256x256xf32, #tpu.memory_space<vmem>>, vector<1x256x256xf32>,
    return
  }
  func.func @transform_0(%arg0: i32, %arg1: i32, %arg2: i32) -> (i32, i32, i32) {
    %c0_i32 = arith.constant 0 : i32
    %c0_i32_0 = arith.constant 0 : i32
    return %arg0, %c0_i32, %arg1 : i32, i32, i32
  }
  func.func @transform_1(%arg0: i32, %arg1: i32, %arg2: i32) -> (i32, i32, i32) {
    %c0_i32 = arith.constant 0 : i32
    %c0_i32_0 = arith.constant 0 : i32
    return %arg0, %c0_i32, %arg2 : i32, i32, i32
  }
  func.func @transform_2(%arg0: i32, %arg1: i32, %arg2: i32) -> (i32, i32, i32) {
    %c0_i32 = arith.constant 0 : i32
    return %arg0, %arg1, %arg2 : i32, i32, i32
  }
}

</mosaic_0001>

<bundles_post_ra>
// kernel: feature_correlation.1
= control target key start
LH: loop header
LB: loop body
LE: loop exit
PB: predicated region body
PF: predicated region fallthrough
CT: control target
= control target key end

     0   :  { %s967_s9 = smov 0   ;;  %s969_s10 = smov 0   ;;  %s1137_s0 = inlined_call_operand.vmem [shape: f32[2,8,256], index: 0, kind: input, shape index: {}]   ;;  %s1138_s1 = inlined_call_operand.vmem [shape: f32[2,8,256], index: 1, kind: input, shape index: {}]   ;;  %s1139_s2 = inlined_call_operand.vmem [shape: f32[2,256,256], index: 2, kind: output, shape index: {}]  }
   0x1   :  { %s971_s11 = smov 0  }
   0x2 LB: > { %s31_s12 = sadd.s32 1, %s945_s10  ;;  %p856_p0 = scmp.ge.s32.totalorder %s949_s11, 1  ;;  %s949_s11 = sphi %s971_s11, %s12_s11   ;;  %s945_s10 = sphi %s969_s10, %s1141_s10   ;;  %s941_s9 = sphi %s967_s9, %s1140_s9  }
   0x3   : > { %p33_p1 = scmp.ge.s32.totalorder %s31_s12, 2  ;;  %p159_p2 = scmp.lt.s32.totalorder %s949_s11, 3 }
   0x5   : > { %s1143_s12 = smov (%p33_p1, %s31_s12), 0  ;;  %p160_p3 = pnand %p856_p0, %p159_p2 }
   0x6   : > { %p204_p4 = scmp.lt.s32.totalorder (!%p160_p3), %s941_s9, 1  ;;  %v951_v0 = vmov (!%p160_p3), 0.0   ;;  %vm307_vm0 = vcmask (!%p160_p3), 64512  }
   0x7   : > { %163 = sbr.rel (%p160_p3) target bundleno = 485 (0x1e5), region = 28  ;;  %468 = vmatprep.mubr.f32.mxu0 (!%p160_p3), %v951_v0  ;;  %564 = vmatprep.mubr.f32.mxu1 (!%p160_p3), %v951_v0 }
   0xe   : > { %s1145_s9 = smov (!%p204_p4, %s941_s9), 1 }
   0xf   : > { %s897_s13 = sshll.u32 %s1145_s9, 4  ;;  %s899_s20 = sshll.u32 %s1145_s9, 9 }
  0x10   : > { %s211_s16 = scalar_lea.vmem %s1137_s0, %s897_s13  ;;  %s221_s19 = scalar_lea.vmem %s1138_s1, %s897_s13 }
  0x11   : > { %v239_v1 = vld [vmem:[%s211_s16] sm:$0xff]  ;;  %v242_v2 = vld [vmem:[%s221_s19 + $0x8] sm:$0xff]  ;;  %s1062_s23 = scalar_lea.vmem %s1139_s2, %s899_s20 }
  0x12   : > { %243 = vxpose.xlu0.b32.start.end [1/1] (short) %v239_v1, 128  ;;  %404 = vmatprep.subr.mxu0 %v242_v2  ;;  %v241_v3 = vld [vmem:[%s221_s19] sm:$0xff]  ;;  %v240_v4 = vld [vmem:[%s211_s16 + $0x8] sm:$0xff] }
  0x13   : > { %405 = vmatpush1.msra.mxu0 %v241_v3  ;;  %900 = vmatprep.subr.mxu1 %v242_v2 }
  0x14   : > { %901 = vmatpush1.msra.mxu1 %v241_v3 }
  0x4f   : > { %275 = vxpose.xlu0.b32.start.end [1/1] (short) %v240_v4, 128 }
  0x92   : > { %v259_v5 = vpop.trf.xlu0 }
  0x93   : > { %863 = vmatmul.mubr.msk.f32.vlgmr.msra.gmra.mrb[0].mxu0 %vm307_vm0, %v259_v5 }
  0x94   : > { %474 = vmatprep.mubr.f32.mxu0 %v951_v0 }
  0x96   : > { %v260_v6 = vpop.trf.xlu0 }
  0x97   : > { %864 = vmatmul.mubr.msk.f32.gmra.mrb[2].mxu0 %vm307_vm0, %v260_v6 }
  0x98   : > { %480 = vmatprep.mubr.f32.mxu0 %v951_v0 }
  0x9a   : > { %v261_v7 = vpop.trf.xlu0 }
  0x9b   : > { %865 = vmatmul.mubr.msk.f32.gmra.mrb[4].mxu0 %vm307_vm0, %v261_v7 }
  0x9c   : > { %486 = vmatprep.mubr.f32.mxu0 %v951_v0 }
  0x9e   : > { %v262_v8 = vpop.trf.xlu0 }
  0x9f   : > { %866 = vmatmul.mubr.msk.f32.gmra.mrb[6].mxu0 %vm307_vm0, %v262_v8 }
  0xa0   : > { %492 = vmatprep.mubr.f32.mxu0 %v951_v0 }
  0xa2   : > { %v263_v9 = vpop.trf.xlu0 }
  0xa3   : > { %867 = vmatmul.mubr.msk.f32.gmra.mrb[8].mxu0 %vm307_vm0, %v263_v9 }
  0xa4   : > { %498 = vmatprep.mubr.f32.mxu0 %v951_v0 }
  0xa6   : > { %v264_v10 = vpop.trf.xlu0 }
  0xa7   : > { %868 = vmatmul.mubr.msk.f32.gmra.mrb[10].mxu0 %vm307_vm0, %v264_v10 }
  0xa8   : > { %504 = vmatprep.mubr.f32.mxu0 %v951_v0 }
  0xaa   : > { %v265_v11 = vpop.trf.xlu0 }
  0xab   : > { %869 = vmatmul.mubr.msk.f32.gmra.mrb[12].mxu0 %vm307_vm0, %v265_v11 }
  0xac   : > { %510 = vmatprep.mubr.f32.mxu0 %v951_v0 }
  0xae   : > { %v266_v12 = vpop.trf.xlu0 }
  0xaf   : > { %870 = vmatmul.mubr.msk.f32.gmra.mrb[14].mxu0 %vm307_vm0, %v266_v12 }
  0xb0   : > { %516 = vmatprep.mubr.f32.mxu0 %v951_v0 }
  0xb2   : > { %v267_v13 = vpop.trf.xlu0 }
  0xb3   : > { %871 = vmatmul.mubr.msk.f32.gmra.mrb[16].mxu0 %vm307_vm0, %v267_v13 }
  0xb4   : > { %522 = vmatprep.mubr.f32.mxu0 %v951_v0 }
  0xb6   : > { %v268_v14 = vpop.trf.xlu0 }
  0xb7   : > { %872 = vmatmul.mubr.msk.f32.gmra.mrb[18].mxu0 %vm307_vm0, %v268_v14 }
  0xb8   : > { %528 = vmatprep.mubr.f32.mxu0 %v951_v0 }
  0xba   : > { %v269_v15 = vpop.trf.xlu0 }
  0xbb   : > { %873 = vmatmul.mubr.msk.f32.gmra.mrb[20].mxu0 %vm307_vm0, %v269_v15 }
  0xbc   : > { %534 = vmatprep.mubr.f32.mxu0 %v951_v0 }
  0xbe   : > { %v270_v16 = vpop.trf.xlu0 }
  0xbf   : > { %874 = vmatmul.mubr.msk.f32.gmra.mrb[22].mxu0 %vm307_vm0, %v270_v16 }
  0xc0   : > { %540 = vmatprep.mubr.f32.mxu0 %v951_v0 }
  0xc2   : > { %v271_v17 = vpop.trf.xlu0 }
  0xc3   : > { %875 = vmatmul.mubr.msk.f32.gmra.mrb[24].mxu0 %vm307_vm0, %v271_v17 }
  0xc4   : > { %546 = vmatprep.mubr.f32.mxu0 %v951_v0 }
  0xc6   : > { %v272_v18 = vpop.trf.xlu0 }
  0xc7   : > { %876 = vmatmul.mubr.msk.f32.gmra.mrb[26].mxu0 %vm307_vm0, %v272_v18 }
  0xc8   : > { %552 = vmatprep.mubr.f32.mxu0 %v951_v0 }
  0xca   : > { %v273_v19 = vpop.trf.xlu0 }
  0xcb   : > { %877 = vmatmul.mubr.msk.f32.gmra.mrb[28].mxu0 %vm307_vm0, %v273_v19 }
  0xcc   : > { %558 = vmatprep.mubr.f32.mxu0 %v951_v0 }
  0xce   : > { %v274_v20 = vpop.trf.xlu0 }
  0xcf   : > { %878 = vmatmul.mubr.msk.f32.gmra.mrb[30].mxu0 %vm307_vm0, %v274_v20 }
  0xd2   : > { %v291_v21 = vpop.trf.xlu0 }
  0xd3   : > { %879 = vmatmul.mubr.msk.f32.vlgmr.msra.gmra.mrb[0].mxu1 %vm307_vm0, %v291_v21 }
  0xd4   : > { %570 = vmatprep.mubr.f32.mxu1 %v951_v0 }
  0xd6   : > { %v292_v22 = vpop.trf.xlu0 }
  0xd7   : > { %880 = vmatmul.mubr.msk.f32.gmra.mrb[2].mxu1 %vm307_vm0, %v292_v22 }
  0xd8   : > { %576 = vmatprep.mubr.f32.mxu1 %v951_v0 }
  0xda   : > { %v293_v23 = vpop.trf.xlu0 }
  0xdb   : > { %881 = vmatmul.mubr.msk.f32.gmra.mrb[4].mxu1 %vm307_vm0, %v293_v23 }
  0xdc   : > { %582 = vmatprep.mubr.f32.mxu1 %v951_v0 }
  0xde   : > { %v294_v24 = vpop.trf.xlu0 }
  0xdf   : > { %882 = vmatmul.mubr.msk.f32.gmra.mrb[6].mxu1 %vm307_vm0, %v294_v24 }
  0xe0   : > { %588 = vmatprep.mubr.f32.mxu1 %v951_v0 }
  0xe2   : > { %v295_v25 = vpop.trf.xlu0 }
  0xe3   : > { %883 = vmatmul.mubr.msk.f32.gmra.mrb[8].mxu1 %vm307_vm0, %v295_v25 }
  0xe4   : > { %594 = vmatprep.mubr.f32.mxu1 %v951_v0 }
  0xe6   : > { %v296_v26 = vpop.trf.xlu0 }
  0xe7   : > { %884 = vmatmul.mubr.msk.f32.gmra.mrb[10].mxu1 %vm307_vm0, %v296_v26 }
  0xe8   : > { %600 = vmatprep.mubr.f32.mxu1 %v951_v0 }
  0xea   : > { %v297_v27 = vpop.trf.xlu0 }
  0xeb   : > { %885 = vmatmul.mubr.msk.f32.gmra.mrb[12].mxu1 %vm307_vm0, %v297_v27 }
  0xec   : > { %606 = vmatprep.mubr.f32.mxu1 %v951_v0 }
  0xee   : > { %v298_v28 = vpop.trf.xlu0 }
  0xef   : > { %886 = vmatmul.mubr.msk.f32.gmra.mrb[14].mxu1 %vm307_vm0, %v298_v28 }
  0xf0   : > { %612 = vmatprep.mubr.f32.mxu1 %v951_v0 }
  0xf2   : > { %v299_v29 = vpop.trf.xlu0 }
  0xf3   : > { %887 = vmatmul.mubr.msk.f32.gmra.mrb[16].mxu1 %vm307_vm0, %v299_v29 }
  0xf4   : > { %618 = vmatprep.mubr.f32.mxu1 %v951_v0 }
  0xf6   : > { %v300_v30 = vpop.trf.xlu0 }
  0xf7   : > { %888 = vmatmul.mubr.msk.f32.gmra.mrb[18].mxu1 %vm307_vm0, %v300_v30 }
  0xf8   : > { %624 = vmatprep.mubr.f32.mxu1 %v951_v0 }
  0xfa   : > { %v301_v31 = vpop.trf.xlu0 }
  0xfb   : > { %889 = vmatmul.mubr.msk.f32.gmra.mrb[20].mxu1 %vm307_vm0, %v301_v31 }
  0xfc   : > { %630 = vmatprep.mubr.f32.mxu1 %v951_v0 }
  0xfe   : > { %v302_v32 = vpop.trf.xlu0 }
  0xff   : > { %890 = vmatmul.mubr.msk.f32.gmra.mrb[22].mxu1 %vm307_vm0, %v302_v32 }
 0x100   : > { %636 = vmatprep.mubr.f32.mxu1 %v951_v0 }
 0x102   : > { %v303_v33 = vpop.trf.xlu0 }
 0x103   : > { %891 = vmatmul.mubr.msk.f32.gmra.mrb[24].mxu1 %vm307_vm0, %v303_v33 }
 0x104   : > { %642 = vmatprep.mubr.f32.mxu1 %v951_v0 }
 0x106   : > { %v304_v34 = vpop.trf.xlu0 }
 0x107   : > { %892 = vmatmul.mubr.msk.f32.gmra.mrb[26].mxu1 %vm307_vm0, %v304_v34 }
 0x108   : > { %648 = vmatprep.mubr.f32.mxu1 %v951_v0 }
 0x10a   : > { %v305_v35 = vpop.trf.xlu0 }
 0x10b   : > { %893 = vmatmul.mubr.msk.f32.gmra.mrb[28].mxu1 %vm307_vm0, %v305_v35 }
 0x10c   : > { %654 = vmatprep.mubr.f32.mxu1 %v951_v0 }
 0x10e   : > { %v306_v36 = vpop.trf.xlu0 }
 0x10f   : > { %894 = vmatmul.mubr.msk.f32.gmra.mrb[30].mxu1 %vm307_vm0, %v306_v36 }
 0x166   : > { %v470_v37 = vpop.f32.mrb[0].mxu0 }
 0x167   : > { %661 = vst [vmem:[%s1062_s23] sm:$0xff] %v470_v37  ;;  %v472_v38 = vpop.f32.mrb[1].mxu0 }
 0x168   : > { %662 = vst [vmem:[%s1062_s23 + $0x8] sm:$0xff] %v472_v38 }
 0x16a   : > { %v476_v39 = vpop.f32.mrb[2].mxu0 }
 0x16b   : > { %663 = vst [vmem:[%s1062_s23 + $0x10] sm:$0xff] %v476_v39  ;;  %v478_v40 = vpop.f32.mrb[3].mxu0 }
 0x16c   : > { %664 = vst [vmem:[%s1062_s23 + $0x18] sm:$0xff] %v478_v40 }
 0x16e   : > { %v482_v41 = vpop.f32.mrb[4].mxu0 }
 0x16f   : > { %665 = vst [vmem:[%s1062_s23 + $0x20] sm:$0xff] %v482_v41  ;;  %v484_v42 = vpop.f32.mrb[5].mxu0 }
 0x170   : > { %666 = vst [vmem:[%s1062_s23 + $0x28] sm:$0xff] %v484_v42 }
 0x172   : > { %v488_v43 = vpop.f32.mrb[6].mxu0 }
 0x173   : > { %667 = vst [vmem:[%s1062_s23 + $0x30] sm:$0xff] %v488_v43  ;;  %v490_v44 = vpop.f32.mrb[7].mxu0 }
 0x174   : > { %668 = vst [vmem:[%s1062_s23 + $0x38] sm:$0xff] %v490_v44 }
 0x176   : > { %v494_v45 = vpop.f32.mrb[8].mxu0 }
 0x177   : > { %669 = vst [vmem:[%s1062_s23 + $0x40] sm:$0xff] %v494_v45  ;;  %v496_v46 = vpop.f32.mrb[9].mxu0 }
 0x178   : > { %670 = vst [vmem:[%s1062_s23 + $0x48] sm:$0xff] %v496_v46 }
 0x17a   : > { %v500_v47 = vpop.f32.mrb[10].mxu0 }
 0x17b   : > { %671 = vst [vmem:[%s1062_s23 + $0x50] sm:$0xff] %v500_v47  ;;  %v502_v48 = vpop.f32.mrb[11].mxu0 }
 0x17c   : > { %672 = vst [vmem:[%s1062_s23 + $0x58] sm:$0xff] %v502_v48 }
 0x17e   : > { %v506_v49 = vpop.f32.mrb[12].mxu0 }
 0x17f   : > { %673 = vst [vmem:[%s1062_s23 + $0x60] sm:$0xff] %v506_v49  ;;  %v508_v50 = vpop.f32.mrb[13].mxu0 }
 0x180   : > { %674 = vst [vmem:[%s1062_s23 + $0x68] sm:$0xff] %v508_v50 }
 0x182   : > { %v512_v51 = vpop.f32.mrb[14].mxu0 }
 0x183   : > { %675 = vst [vmem:[%s1062_s23 + $0x70] sm:$0xff] %v512_v51  ;;  %v514_v52 = vpop.f32.mrb[15].mxu0 }
 0x184   : > { %676 = vst [vmem:[%s1062_s23 + $0x78] sm:$0xff] %v514_v52 }
 0x186   : > { %v518_v53 = vpop.f32.mrb[16].mxu0 }
 0x187   : > { %677 = vst [vmem:[%s1062_s23 + $0x80] sm:$0xff] %v518_v53  ;;  %v520_v54 = vpop.f32.mrb[17].mxu0 }
 0x188   : > { %678 = vst [vmem:[%s1062_s23 + $0x88] sm:$0xff] %v520_v54 }
 0x18a   : > { %v524_v55 = vpop.f32.mrb[18].mxu0 }
 0x18b   : > { %679 = vst [vmem:[%s1062_s23 + $0x90] sm:$0xff] %v524_v55  ;;  %v526_v56 = vpop.f32.mrb[19].mxu0 }
 0x18c   : > { %680 = vst [vmem:[%s1062_s23 + $0x98] sm:$0xff] %v526_v56 }
 0x18e   : > { %v530_v57 = vpop.f32.mrb[20].mxu0 }
 0x18f   : > { %681 = vst [vmem:[%s1062_s23 + $0xa0] sm:$0xff] %v530_v57  ;;  %v532_v58 = vpop.f32.mrb[21].mxu0 }
 0x190   : > { %682 = vst [vmem:[%s1062_s23 + $0xa8] sm:$0xff] %v532_v58 }
 0x192   : > { %v536_v59 = vpop.f32.mrb[22].mxu0 }
 0x193   : > { %683 = vst [vmem:[%s1062_s23 + $0xb0] sm:$0xff] %v536_v59  ;;  %v538_v60 = vpop.f32.mrb[23].mxu0 }
 0x194   : > { %684 = vst [vmem:[%s1062_s23 + $0xb8] sm:$0xff] %v538_v60 }
 0x196   : > { %v542_v61 = vpop.f32.mrb[24].mxu0 }
 0x197   : > { %685 = vst [vmem:[%s1062_s23 + $0xc0] sm:$0xff] %v542_v61  ;;  %v544_v62 = vpop.f32.mrb[25].mxu0 }
 0x198   : > { %686 = vst [vmem:[%s1062_s23 + $0xc8] sm:$0xff] %v544_v62 }
 0x19a   : > { %v548_v63 = vpop.f32.mrb[26].mxu0 }
 0x19b   : > { %687 = vst [vmem:[%s1062_s23 + $0xd0] sm:$0xff] %v548_v63  ;;  %v550_v0 = vpop.f32.mrb[27].mxu0 }
 0x19c   : > { %688 = vst [vmem:[%s1062_s23 + $0xd8] sm:$0xff] %v550_v0 }
 0x19e   : > { %v554_v1 = vpop.f32.mrb[28].mxu0 }
 0x19f   : > { %689 = vst [vmem:[%s1062_s23 + $0xe0] sm:$0xff] %v554_v1  ;;  %v556_v2 = vpop.f32.mrb[29].mxu0 }
 0x1a0   : > { %690 = vst [vmem:[%s1062_s23 + $0xe8] sm:$0xff] %v556_v2 }
 0x1a2   : > { %v560_v3 = vpop.f32.mrb[30].mxu0 }
 0x1a3   : > { %691 = vst [vmem:[%s1062_s23 + $0xf0] sm:$0xff] %v560_v3  ;;  %v562_v4 = vpop.f32.mrb[31].mxu0 }
 0x1a4   : > { %692 = vst [vmem:[%s1062_s23 + $0xf8] sm:$0xff] %v562_v4 }
 0x1a6   : > { %v566_v5 = vpop.f32.mrb[0].mxu1 }
 0x1a7   : > { %693 = vst [vmem:[%s1062_s23 + $0x100] sm:$0xff] %v566_v5  ;;  %v568_v6 = vpop.f32.mrb[1].mxu1 }
 0x1a8   : > { %694 = vst [vmem:[%s1062_s23 + $0x108] sm:$0xff] %v568_v6 }
 0x1aa   : > { %v572_v7 = vpop.f32.mrb[2].mxu1 }
 0x1ab   : > { %695 = vst [vmem:[%s1062_s23 + $0x110] sm:$0xff] %v572_v7  ;;  %v574_v8 = vpop.f32.mrb[3].mxu1 }
 0x1ac   : > { %696 = vst [vmem:[%s1062_s23 + $0x118] sm:$0xff] %v574_v8 }
 0x1ae   : > { %v578_v9 = vpop.f32.mrb[4].mxu1 }
 0x1af   : > { %697 = vst [vmem:[%s1062_s23 + $0x120] sm:$0xff] %v578_v9  ;;  %v580_v10 = vpop.f32.mrb[5].mxu1 }
 0x1b0   : > { %698 = vst [vmem:[%s1062_s23 + $0x128] sm:$0xff] %v580_v10 }
 0x1b2   : > { %v584_v11 = vpop.f32.mrb[6].mxu1 }
 0x1b3   : > { %699 = vst [vmem:[%s1062_s23 + $0x130] sm:$0xff] %v584_v11  ;;  %v586_v12 = vpop.f32.mrb[7].mxu1 }
 0x1b4   : > { %700 = vst [vmem:[%s1062_s23 + $0x138] sm:$0xff] %v586_v12 }
 0x1b6   : > { %v590_v13 = vpop.f32.mrb[8].mxu1 }
 0x1b7   : > { %701 = vst [vmem:[%s1062_s23 + $0x140] sm:$0xff] %v590_v13  ;;  %v592_v14 = vpop.f32.mrb[9].mxu1 }
 0x1b8   : > { %702 = vst [vmem:[%s1062_s23 + $0x148] sm:$0xff] %v592_v14 }
 0x1ba   : > { %v596_v15 = vpop.f32.mrb[10].mxu1 }
 0x1bb   : > { %703 = vst [vmem:[%s1062_s23 + $0x150] sm:$0xff] %v596_v15  ;;  %v598_v16 = vpop.f32.mrb[11].mxu1 }
 0x1bc   : > { %704 = vst [vmem:[%s1062_s23 + $0x158] sm:$0xff] %v598_v16 }
 0x1be   : > { %v602_v17 = vpop.f32.mrb[12].mxu1 }
 0x1bf   : > { %705 = vst [vmem:[%s1062_s23 + $0x160] sm:$0xff] %v602_v17  ;;  %v604_v18 = vpop.f32.mrb[13].mxu1 }
 0x1c0   : > { %706 = vst [vmem:[%s1062_s23 + $0x168] sm:$0xff] %v604_v18 }
 0x1c2   : > { %v608_v19 = vpop.f32.mrb[14].mxu1 }
 0x1c3   : > { %707 = vst [vmem:[%s1062_s23 + $0x170] sm:$0xff] %v608_v19  ;;  %v610_v20 = vpop.f32.mrb[15].mxu1 }
 0x1c4   : > { %708 = vst [vmem:[%s1062_s23 + $0x178] sm:$0xff] %v610_v20 }
 0x1c6   : > { %v614_v21 = vpop.f32.mrb[16].mxu1 }
 0x1c7   : > { %709 = vst [vmem:[%s1062_s23 + $0x180] sm:$0xff] %v614_v21  ;;  %v616_v22 = vpop.f32.mrb[17].mxu1 }
 0x1c8   : > { %710 = vst [vmem:[%s1062_s23 + $0x188] sm:$0xff] %v616_v22 }
 0x1ca   : > { %v620_v23 = vpop.f32.mrb[18].mxu1 }
 0x1cb   : > { %711 = vst [vmem:[%s1062_s23 + $0x190] sm:$0xff] %v620_v23  ;;  %v622_v24 = vpop.f32.mrb[19].mxu1 }
 0x1cc   : > { %712 = vst [vmem:[%s1062_s23 + $0x198] sm:$0xff] %v622_v24 }
 0x1ce   : > { %v626_v25 = vpop.f32.mrb[20].mxu1 }
 0x1cf   : > { %713 = vst [vmem:[%s1062_s23 + $0x1a0] sm:$0xff] %v626_v25  ;;  %v628_v26 = vpop.f32.mrb[21].mxu1 }
 0x1d0   : > { %714 = vst [vmem:[%s1062_s23 + $0x1a8] sm:$0xff] %v628_v26 }
 0x1d2   : > { %v632_v27 = vpop.f32.mrb[22].mxu1 }
 0x1d3   : > { %715 = vst [vmem:[%s1062_s23 + $0x1b0] sm:$0xff] %v632_v27  ;;  %v634_v28 = vpop.f32.mrb[23].mxu1 }
 0x1d4   : > { %716 = vst [vmem:[%s1062_s23 + $0x1b8] sm:$0xff] %v634_v28 }
 0x1d6   : > { %v638_v29 = vpop.f32.mrb[24].mxu1 }
 0x1d7   : > { %717 = vst [vmem:[%s1062_s23 + $0x1c0] sm:$0xff] %v638_v29  ;;  %v640_v30 = vpop.f32.mrb[25].mxu1 }
 0x1d8   : > { %718 = vst [vmem:[%s1062_s23 + $0x1c8] sm:$0xff] %v640_v30 }
 0x1da   : > { %v644_v31 = vpop.f32.mrb[26].mxu1 }
 0x1db   : > { %719 = vst [vmem:[%s1062_s23 + $0x1d0] sm:$0xff] %v644_v31  ;;  %v646_v32 = vpop.f32.mrb[27].mxu1 }
 0x1dc   : > { %720 = vst [vmem:[%s1062_s23 + $0x1d8] sm:$0xff] %v646_v32 }
 0x1de   : > { %v650_v33 = vpop.f32.mrb[28].mxu1 }
 0x1df   : > { %721 = vst [vmem:[%s1062_s23 + $0x1e0] sm:$0xff] %v650_v33  ;;  %v652_v34 = vpop.f32.mrb[29].mxu1 }
 0x1e0   : > { %722 = vst [vmem:[%s1062_s23 + $0x1e8] sm:$0xff] %v652_v34 }
 0x1e2   : > { %v656_v35 = vpop.f32.mrb[30].mxu1 }
 0x1e3   : > { %723 = vst [vmem:[%s1062_s23 + $0x1f0] sm:$0xff] %v656_v35  ;;  %v658_v36 = vpop.f32.mrb[31].mxu1 }
 0x1e4   : > { %724 = vst [vmem:[%s1062_s23 + $0x1f8] sm:$0xff] %v658_v36 }
 0x1e5 PF: > { %s12_s11 = sadd.s32 1, %s949_s11   ;;  %s1140_s9 = smov %s945_s10 }
 0x1e6   : > { %p9_p5 = scmp.ge.s32.totalorder %s12_s11, 4   ;;  %s1141_s10 = smov %s1143_s12 }
 0x1e8   :  { %11 = sbr.rel (!%p9_p5) target bundleno = 2 (0x2), region = 61 }

</bundles_post_ra>
